<compile_context>
chip_gen: v7x
topology: tpu7x:2x2x1
jax: 0.10.0
libtpu: 0.0.40
codegen_flags: <defaults>
</compile_context>

<pallas_src>
import functools

import jax
import jax.numpy as jnp
from jax.experimental import pallas as pl
from jax.experimental.pallas import tpu as pltpu


def _round_up(x, m):
    return ((x + m - 1) // m) * m


def _value_mlp_kernel(x_ref, w1_ref, b1_ref, w2_ref, b2_ref, w3_ref, b3_ref,
                      o_ref):
    x = x_ref[...]                                   # (TILE_B, F) bf16

    # Layer 1: Linear(F, 256) on MXU (bf16 in, f32 acc) + bias/ReLU on VPU.
    h1 = jnp.dot(x, w1_ref[...], preferred_element_type=jnp.float32)
    h1 = jnp.maximum(h1 + b1_ref[...], 0.0)          # f32

    # Layer 2: Linear(256, 128) on MXU (bf16 in, f32 acc) + bias/ReLU on VPU.
    h2 = jnp.dot(h1.astype(jnp.bfloat16), w2_ref[...],
                 preferred_element_type=jnp.float32)
    h2 = jnp.maximum(h2 + b2_ref[...], 0.0)          # (TILE_B, 128) f32

    # Layer 3: Linear(128, 1). N=1 matmul wastes the MXU; do it as an
    # elementwise multiply + lane reduction on VPU/XLU slots instead.
    v = jnp.sum(h2 * w3_ref[...], axis=-1, keepdims=True)   # (TILE_B, 1)
    o_ref[...] = v + b3_ref[...]


def mahjong_value_network(features, params, *, tile_b=512):
    """features: (B, feature_dim) f32 -> (B, 1) f32."""
    w1, b1, w2, b2, w3, b3 = params
    B, F = features.shape
    H1 = w1.shape[1]      # 256
    H2 = w2.shape[1]      # 128

    # bf16 operands for the MXU side; biases and final projection stay f32.
    x = features.astype(jnp.bfloat16)
    w1b = w1.astype(jnp.bfloat16)
    w2b = w2.astype(jnp.bfloat16)
    w3_row = w3.reshape(1, H2).astype(jnp.float32)   # (1, 128)
    b1r = b1.reshape(1, H1).astype(jnp.float32)
    b2r = b2.reshape(1, H2).astype(jnp.float32)
    b3r = b3.reshape(1, 1).astype(jnp.float32)

    # Tile the batch; keep tiles sublane-aligned (multiple of 8) and pad B.
    tile_b = min(tile_b, _round_up(B, 8))
    padded_b = _round_up(B, tile_b)
    if padded_b != B:
        x = jnp.pad(x, ((0, padded_b - B), (0, 0)))
    grid = (padded_b // tile_b,)

    const = lambda shape: pl.BlockSpec(shape, lambda i: (0, 0))

    flops = 2 * B * (F * H1 + H1 * H2 + H2)
    bytes_accessed = (padded_b * F * 2            # feature tiles (bf16)
                      + w1b.size * 2 + w2b.size * 2
                      + (b1r.size + b2r.size + w3_row.size + b3r.size) * 4
                      + padded_b * 4)             # output (f32)
    cost = pl.CostEstimate(flops=flops, transcendentals=0,
                           bytes_accessed=int(bytes_accessed))

    out = pl.pallas_call(
        _value_mlp_kernel,
        out_shape=jax.ShapeDtypeStruct((padded_b, 1), jnp.float32),
        grid=grid,
        in_specs=[
            pl.BlockSpec((tile_b, F), lambda i: (i, 0)),   # features tile
            const(w1b.shape), const(b1r.shape),            # resident weights
            const(w2b.shape), const(b2r.shape),
            const(w3_row.shape), const(b3r.shape),
        ],
        out_specs=pl.BlockSpec((tile_b, 1), lambda i: (i, 0)),
        compiler_params=pltpu.CompilerParams(
            dimension_semantics=("parallel",)),
        cost_estimate=cost,
    )(x, w1b, b1r, w2b, b2r, w3_row, b3r)

    return out[:B]


def init_params(key, feature_dim=128):
    """Deterministic init mimicking nn.Linear (uniform +- 1/sqrt(fan_in)).

    Weights stored as (in_features, out_features); biases as (1, out)."""
    dims = [(feature_dim, 256), (256, 128), (128, 1)]
    params = []
    for (fan_in, fan_out) in dims:
        key, kw, kb = jax.random.split(key, 3)
        bound = 1.0 / jnp.sqrt(float(fan_in))
        w = jax.random.uniform(kw, (fan_in, fan_out), jnp.float32,
                               minval=-bound, maxval=bound)
        b = jax.random.uniform(kb, (1, fan_out), jnp.float32,
                               minval=-bound, maxval=bound)
        params.extend([w, b])
    return tuple(params)


def reference_forward_f32(features, params):
    """Plain f32 JAX reference of the PyTorch forward."""
    w1, b1, w2, b2, w3, b3 = params
    h = jnp.maximum(features @ w1 + b1, 0.0)
    h = jnp.maximum(h @ w2 + b2, 0.0)
    return h @ w3 + b3


def reference_forward_bf16(features, params):
    """Matched-precision reference (bf16 matmuls, f32 accumulation)."""
    w1, b1, w2, b2, w3, b3 = params
    h = jnp.dot(features.astype(jnp.bfloat16), w1.astype(jnp.bfloat16),
                preferred_element_type=jnp.float32)
    h = jnp.maximum(h + b1, 0.0)
    h = jnp.dot(h.astype(jnp.bfloat16), w2.astype(jnp.bfloat16),
                preferred_element_type=jnp.float32)
    h = jnp.maximum(h + b2, 0.0)
    return jnp.dot(h, w3, preferred_element_type=jnp.float32) + b3


if __name__ == "__main__":
    key = jax.random.PRNGKey(0)
    k_feat, k_params = jax.random.split(key)

    feature_dim = 128
    # Not a multiple of the tile so the padding path is exercised; large
    # enough that the MXU sees full row-blocks per tile.  (For production
    # micro-batches <~256, prefer plain XLA — the kernel pays fixed per-step
    # overhead that tiny batches cannot amortize.)
    batch = 384
    tile_b = 256

    features = jax.random.normal(k_feat, (batch, feature_dim), jnp.float32)
    params = init_params(k_params, feature_dim)

    fwd = functools.partial(mahjong_value_network, tile_b=tile_b)
    out = jax.block_until_ready(fwd(features, params))

    ref_bf16 = reference_forward_bf16(features, params)
    ref_f32 = reference_forward_f32(features, params)

    assert out.shape == (batch, 1)
    # Tight check vs a matched-precision (bf16-matmul) reference.
    assert jnp.allclose(out, ref_bf16, atol=1e-3, rtol=1e-3), \
        "mismatch vs bf16-matched reference"
    # Loose check vs the full-f32 reference (bf16 rounding only).
    assert jnp.allclose(out, ref_f32, atol=5e-2, rtol=5e-2), \
        "mismatch vs f32 reference"

    print("KERNEL_OK")
</pallas_src>

<mosaic_0001>
module attributes {stable_mosaic.version = 11 : i64} {
  func.func @_value_mlp_kernel(%arg0: i32, %arg1: memref<256x128xbf16, #tpu.memory_space<vmem>>, %arg2: memref<128x256xbf16, #tpu.memory_space<vmem>>, %arg3: memref<1x256xf32, #tpu.memory_space<vmem>>, %arg4: memref<256x128xbf16, #tpu.memory_space<vmem>>, %arg5: memref<1x128xf32, #tpu.memory_space<vmem>>, %arg6: memref<1x128xf32, #tpu.memory_space<vmem>>, %arg7: memref<1x1xf32, #tpu.memory_space<vmem>>, %arg8: memref<256x1xf32, #tpu.memory_space<vmem>>) attributes {dimension_semantics = [#tpu.dimension_semantics<parallel>], iteration_bounds = array<i64: 2>, scalar_prefetch = 0 : i64, scratch_operands = 0 : i64, tpu.core_type = #tpu.core_type<tc>, window_params = [{transform_indices = @transform_0, window_bounds = array<i64: 256, 128>}, {pipeline_mode = #tpu.pipeline_mode<synchronous>, transform_indices = @transform_1, window_bounds = array<i64: 128, 256>}, {pipeline_mode = #tpu.pipeline_mode<synchronous>, transform_indices = @transform_2, window_bounds = array<i64: 1, 256>}, {pipeline_mode = #tpu.pipeline_mode<synchronous>, transform_indices = @transform_3, window_bounds = array<i64: 256, 128>}, {pipeline_mode = #tpu.pipeline_mode<synchronous>, transform_indices = @transform_4, window_bounds = array<i64: 1, 128>}, {pipeline_mode = #tpu.pipeline_mode<synchronous>, transform_indices = @transform_5, window_bounds = array<i64: 1, 128>}, {pipeline_mode = #tpu.pipeline_mode<synchronous>, transform_indices = @transform_6, window_bounds = array<i64: 1, 1>}, {transform_indices = @transform_7, window_bounds = array<i64: 256, 1>}]} {
    %c0 = arith.constant 0 : index
    %c0_0 = arith.constant 0 : index
    %0 = vector.load %arg1[%c0, %c0_0] : memref<256x128xbf16, #tpu.memory_space<vmem>>, vector<256x128xbf16>
    %c0_1 = arith.constant 0 : index
    %c0_2 = arith.constant 0 : index
    %1 = vector.load %arg2[%c0_1, %c0_2] : memref<128x256xbf16, #tpu.memory_space<vmem>>, vector<128x256xbf16>
    %cst = arith.constant dense<0.000000e+00> : vector<256x256xf32>
    %2 = tpu.matmul %0, %1, %cst {dimension_numbers = #tpu.dot_dimension_numbers<[1], [0], [0], [1], [0, 0, 1, 1], [], []>} : vector<256x128xbf16>, vector<128x256xbf16>, vector<256x256xf32> -> vector<256x256xf32>
    %c0_3 = arith.constant 0 : index
    %c0_4 = arith.constant 0 : index
    %3 = vector.load %arg3[%c0_3, %c0_4] : memref<1x256xf32, #tpu.memory_space<vmem>>, vector<1x256xf32>
    %4 = vector.broadcast %3 : vector<1x256xf32> to vector<256x256xf32>
    %5 = arith.addf %2, %4 : vector<256x256xf32>
    %cst_5 = arith.constant 0.000000e+00 : f32
    %6 = vector.broadcast %cst_5 : f32 to vector<256x256xf32>
    %7 = arith.maximumf %5, %6 : vector<256x256xf32>
    %8 = arith.truncf %7 : vector<256x256xf32> to vector<256x256xbf16>
    %c0_6 = arith.constant 0 : index
    %c0_7 = arith.constant 0 : index
    %9 = vector.load %arg4[%c0_6, %c0_7] : memref<256x128xbf16, #tpu.memory_space<vmem>>, vector<256x128xbf16>
    %cst_8 = arith.constant dense<0.000000e+00> : vector<256x128xf32>
    %10 = tpu.matmul %8, %9, %cst_8 {dimension_numbers = #tpu.dot_dimension_numbers<[1], [0], [0], [1], [0, 0, 1, 1], [], []>} : vector<256x256xbf16>, vector<256x128xbf16>, vector<256x128xf32> -> vector<256x128xf32>
    %c0_9 = arith.constant 0 : index
    %c0_10 = arith.constant 0 : index
    %11 = vector.load %arg5[%c0_9, %c0_10] : memref<1x128xf32, #tpu.memory_space<vmem>>, vector<1x128xf32>
    %12 = vector.broadcast %11 : vector<1x128xf32> to vector<256x128xf32>
    %13 = arith.addf %10, %12 : vector<256x128xf32>
    %cst_11 = arith.constant 0.000000e+00 : f32
    %14 = vector.broadcast %cst_11 : f32 to vector<256x128xf32>
    %15 = arith.maximumf %13, %14 : vector<256x128xf32>
    %c0_12 = arith.constant 0 : index
    %c0_13 = arith.constant 0 : index
    %16 = vector.load %arg6[%c0_12, %c0_13] : memref<1x128xf32, #tpu.memory_space<vmem>>, vector<1x128xf32>
    %17 = vector.broadcast %16 : vector<1x128xf32> to vector<256x128xf32>
    %18 = arith.mulf %15, %17 : vector<256x128xf32>
    %cst_14 = arith.constant dense<0.000000e+00> : vector<256xf32>
    %19 = vector.multi_reduction <add>, %18, %cst_14 [1] : vector<256x128xf32> to vector<256xf32>
    %20 = vector.shape_cast %19 : vector<256xf32> to vector<256x1xf32>
    %c0_15 = arith.constant 0 : index
    %c0_16 = arith.constant 0 : index
    %21 = vector.load %arg7[%c0_15, %c0_16] : memref<1x1xf32, #tpu.memory_space<vmem>>, vector<1x1xf32>
    %22 = vector.broadcast %21 : vector<1x1xf32> to vector<256x1xf32>
    %23 = arith.addf %20, %22 : vector<256x1xf32>
    %c0_17 = arith.constant 0 : index
    %c0_18 = arith.constant 0 : index
    %24 = vector.load %arg8[%c0_17, %c0_18] : memref<256x1xf32, #tpu.memory_space<vmem>>, vector<256x1xf32>
    tpu.vector_store %arg8[%c0_17, %c0_18], %23 {strides = array<i32>} : memref<256x1xf32, #tpu.memory_space<vmem>>, vector<256x1xf32>,
    return
  }
  func.func @transform_0(%arg0: i32) -> (i32, i32) {
    %c0_i32 = arith.constant 0 : i32
    %c0_i32_0 = arith.constant 0 : i32
    return %arg0, %c0_i32 : i32, i32
  }
  func.func @transform_1(%arg0: i32) -> (i32, i32) {
    %c0_i32 = arith.constant 0 : i32
    %c0_i32_0 = arith.constant 0 : i32
    %c0_i32_1 = arith.constant 0 : i32
    return %c0_i32, %c0_i32_0 : i32, i32
  }
  func.func @transform_2(%arg0: i32) -> (i32, i32) {
    %c0_i32 = arith.constant 0 : i32
    %c0_i32_0 = arith.constant 0 : i32
    %c0_i32_1 = arith.constant 0 : i32
    return %c0_i32, %c0_i32_0 : i32, i32
  }
  func.func @transform_3(%arg0: i32) -> (i32, i32) {
    %c0_i32 = arith.constant 0 : i32
    %c0_i32_0 = arith.constant 0 : i32
    %c0_i32_1 = arith.constant 0 : i32
    return %c0_i32, %c0_i32_0 : i32, i32
  }
  func.func @transform_4(%arg0: i32) -> (i32, i32) {
    %c0_i32 = arith.constant 0 : i32
    %c0_i32_0 = arith.constant 0 : i32
    %c0_i32_1 = arith.constant 0 : i32
    return %c0_i32, %c0_i32_0 : i32, i32
  }
  func.func @transform_5(%arg0: i32) -> (i32, i32) {
    %c0_i32 = arith.constant 0 : i32
    %c0_i32_0 = arith.constant 0 : i32
    %c0_i32_1 = arith.constant 0 : i32
    return %c0_i32, %c0_i32_0 : i32, i32
  }
  func.func @transform_6(%arg0: i32) -> (i32, i32) {
    %c0_i32 = arith.constant 0 : i32
    %c0_i32_0 = arith.constant 0 : i32
    %c0_i32_1 = arith.constant 0 : i32
    return %c0_i32, %c0_i32_0 : i32, i32
  }
  func.func @transform_7(%arg0: i32) -> (i32, i32) {
    %c0_i32 = arith.constant 0 : i32
    %c0_i32_0 = arith.constant 0 : i32
    return %arg0, %c0_i32 : i32, i32
  }
}

</mosaic_0001>

<bundles_post_ra>
// kernel: tpu_custom_call.1
= control target key start
LH: loop header
LB: loop body
LE: loop exit
PB: predicated region body
PF: predicated region fallthrough
CT: control target
= control target key end

     0   :  { %s2389_s0 = inlined_call_operand.hbm [shape: bf16[512,128], index: 0, kind: input, shape index: {}]   ;;  %s2390_s1 = inlined_call_operand.hbm [shape: bf16[128,256], index: 1, kind: input, shape index: {}]   ;;  %s2391_s2 = inlined_call_operand.vmem [shape: f32[1,256], index: 2, kind: input, shape index: {}]   ;;  %s2392_s3 = inlined_call_operand.hbm [shape: bf16[256,128], index: 3, kind: input, shape index: {}]   ;;  %s2393_s4 = inlined_call_operand.vmem [shape: f32[1,128], index: 4, kind: input, shape index: {}]   ;;  %s2394_s5 = inlined_call_operand.vmem [shape: f32[1,128], index: 5, kind: input, shape index: {}]   ;;  %s2395_s6 = inlined_call_operand.<no memory space> [shape: f32[1,1], index: 6, kind: input, shape index: {}]   ;;  %s2396_s7 = inlined_call_operand.vmem [shape: f32[512,1], index: 7, kind: output, shape index: {}]  }
   0x1   :  { %v12_v0 = vstv %s2395_s6 }
   0x2   :  { %13 = vst [vmem:[#allocation2] sm:$0x1] %v12_v0 }
   0x3   :  { %14 = vsyncpa [#allocation4], 0 }
   0x4   :  { %16 = vsyncpa [#allocation4 + $0x1], 0 }
   0x5   :  { %17 = vsyncpa [#allocation6], 0  ;;  %s1926_s26 = smov 0   ;;  %s1928_s27 = smov 0  }
   0x6   :  { %s1930_s28 = smov 0   ;;  %s1932_s29 = smov 0  }
   0x7 LB: > { %s1447_s6 = sadd.s32 4294967295, %s1873_s29   ;;  %p43_p0 = scmp.ne.s32.totalorder %s1865_s27, %s1861_s26  ;;  %s1873_s29 = sphi %s1932_s29, %s2412_s29   ;;  %s1869_s28 = sphi %s1930_s28, %s2411_s28   ;;  %s1865_s27 = sphi %s1928_s27, %s2410_s27   ;;  %s1861_s26 = sphi %s1926_s26, %s2409_s26  }
   0x8   : > { %p1948_p1 = scmp.eq.s32.totalorder %s1447_s6, 0  ;;  %p1449_p2 = scmp.ge.s32.totalorder %s1873_s29, 1 }
   0x9   : > { %p206_p3 = scmp.lt.s32.totalorder %s1873_s29, 3  ;;  %s1875_s10 = smov [#allocation5]  }
   0xa   : > { %s2401_s30 = scalar_select %p1948_p1, 1, 0 }
   0xb   : > { %p1956_p4 = por %p1948_p1, %p43_p0  ;;  %p1960_p5 = pnand %p1449_p2, %p206_p3 }
   0xc   : > { %s218_s11 = sshll.u32 %s1875_s10, 4  ;;  %s1876_s13 = smov [#allocation7]   ;;  %s219_s11 = int_to_ptr.vmem [resolvable:$true] %s218_s11 }
   0xd   : > { %s2402_s8 = scalar_select %p1956_p4, 1, 0 }
   0xe   : > { %s2403_s9 = scalar_select %p1960_p5, 1, 0 }
   0xf   : > { %p1638_p6 = pneg %p1960_p5  ;;  %s234_s14 = sshll.u32 %s1876_s13, 4  ;;  %s1972_s14 = int_to_ptr.vmem [resolvable:$true] %s234_s14 }
  0x10   : > { %s1749_s17 = scalar_lea.hbm %s2390_s1, 2048 }
  0x11   : > { %p1968_p7 = pnand %p1638_p6, %p1948_p1  ;;  %p1750_p8 = scmp.ne.s32.totalorder %s2390_s1, %s1749_s17 }
  0x12   : > { %p1756_p12 = scmp.lt.u32.totalorder %s1749_s17, %s2390_s1 }
  0x13   : > { %p1751_p9 = pneg %p1968_p7 }
  0x15   : > { %p1752_p10 = pnand %p1751_p9, %p1750_p8 }
  0x17   : > { %p1753_p11 = pneg %p1752_p10 }
  0x19   : > { %p1758_p13 = pnand %p1756_p12, %p1753_p11 }
  0x1b   : > { %1761 = shalt.err (!%p1758_p13)
}
  0x1c   : > { %s1762_s22 = scalar_lea.vmem %s219_s11, 2048  ;;  %p1770_p6 = scmp.lt.s32.totalorder %s219_s11, %s219_s11 }
  0x1d   : > { %p1763_p0 = scmp.ne.s32.totalorder %s219_s11, %s1762_s22  ;;  %p1771_p1 = scmp.lt.s32.totalorder %s1762_s22, %s1762_s22 }
  0x1f   : > { %p1765_p2 = pnand %p1763_p0, %p1751_p9  ;;  %p1772_p4 = por %p1771_p1, %p1770_p6 }
  0x21   : > { %p1766_p3 = pneg %p1765_p2 }
  0x23   : > { %p1773_p5 = pnand %p1772_p4, %p1766_p3 }
  0x25   : > { %1776 = shalt.err (!%p1773_p5)
}
  0x26   : > { %s1877_s23 = smov 128   ;;  %s1878_s24 = smov 8  }
  0x27   : > { %1641 = dma.hbm_to_vmem [thread:$0]  (!%p1968_p7), %s2390_s1, 2048, %s219_s11, [#allocation6], %s1877_s23, %s1877_s23, %s1878_s24  }
  0x28   : > { %s1777_s15 = scalar_lea.hbm %s2392_s3, 2048 }
  0x29   : > { %p1778_p8 = scmp.ne.s32.totalorder %s2392_s3, %s1777_s15  ;;  %p1784_p5 = scmp.lt.u32.totalorder %s1777_s15, %s2392_s3 }
  0x2b   : > { %p1780_p1 = pnand %p1778_p8, %p1751_p9 }
  0x2d   : > { %p1781_p4 = pneg %p1780_p1 }
  0x2f   : > { %p1786_p10 = pnand %p1784_p5, %p1781_p4 }
  0x31   : > { %1789 = shalt.err (!%p1786_p10)
}
  0x32   : > { %s1790_s11 = scalar_lea.vmem %s1972_s14, 2048  ;;  %p1798_p0 = scmp.lt.s32.totalorder %s1972_s14, %s1972_s14 }
  0x33   : > { %p1791_p11 = scmp.ne.s32.totalorder %s1972_s14, %s1790_s11  ;;  %p1799_p2 = scmp.lt.s32.totalorder %s1790_s11, %s1790_s11 }
  0x35   : > { %p1793_p12 = pnand %p1791_p11, %p1751_p9  ;;  %p1800_p3 = por %p1799_p2, %p1798_p0 }
  0x37   : > { %p1794_p13 = pneg %p1793_p12 }
  0x39   : > { %p1801_p6 = pnand %p1800_p3, %p1794_p13 }
  0x3b   : > { %1804 = shalt.err (!%p1801_p6)
}
  0x3c   : > { %s1879_s20 = smov 64   ;;  %s1880_s21 = smov 4  }
  0x3d   : > { %1644 = dma.hbm_to_vmem [thread:$0]  (!%p1968_p7), %s2392_s3, 2048, %s1972_s14, [#allocation6], %s1879_s20, %s1879_s20, %s1880_s21  }
  0x3e   : > { %s2025_s24 = sadd.s32 1, %s1873_s29   ;;  %s30_s26 = sadd.s32 1, %s1869_s28 }
  0x3f   : > { %s27_s25 = ssub.s32 %s1873_s29, %s2025_s24  ;;  %p37_p8 = scmp.ne.s32.totalorder %s1869_s28, %s1865_s27 }
  0x40   : > { %p28_p9 = scmp.eq.s32.totalorder %s27_s25, 0  ;;  %p38_p1 = scmp.eq.s32.totalorder %s1873_s29, 0 }
  0x41   : > { %p1651_p5 = scmp.lt.s32.totalorder %s1873_s29, 2  ;;  %s257_s12 = sand.u32 1, %s1869_s28  }
  0x42   : > { %s2034_s10 = scalar_select %p28_p9, %s1869_s28, %s30_s26  }
  0x43   : > { %p39_p4 = por %p38_p1, %p37_p8  ;;  %s1515_s13 = sshll.u32 %s1873_s29, 11 }
  0x44   : > { %s1453_s15 = sshll.u32 %s257_s12, 7  ;;  %s2042_s18 = scalar_lea.hbm %s2389_s0, %s1515_s13 }
  0x45   : > { %s261_s14 = scalar_lea.vmem [#allocation3], %s1453_s15  ;;  %p2044_p7 = pnand %p1651_p5, %p39_p4 }
  0x46   : > { %s268_s19 = sshll.u32 %s261_s14, 4  ;;  %s2050_s22 = scalar_lea.sflag [#allocation4], %s257_s12  ;;  %s2048_s19 = int_to_ptr.vmem [resolvable:$true] %s268_s19 }
  0x47   : > { %s1805_s23 = scalar_lea.hbm %s2042_s18, 2048  ;;  %p1807_p11 = pneg %p2044_p7 }
  0x48   : > { %p1806_p10 = scmp.ne.s32.totalorder %s2042_s18, %s1805_s23  ;;  %s1810_s13 = scalar_lea.hbm %s2389_s0, 4096 }
  0x49   : > { %p1811_p0 = scmp.lt.u32.totalorder %s2042_s18, %s2389_s0  ;;  %p1812_p2 = scmp.lt.u32.totalorder %s1810_s13, %s1805_s23 }
  0x4a   : > { %p1808_p12 = pnand %p1807_p11, %p1806_p10  ;;  %p1814_p6 = scmp.lt.u32.totalorder %s1805_s23, %s2042_s18 }
  0x4b   : > { %p1813_p3 = por %p1812_p2, %p1811_p0 }
  0x4c   : > { %p1809_p13 = pneg %p1808_p12 }
  0x4d   : > { %p1815_p9 = por %p1814_p6, %p1813_p3 }
  0x4f   : > { %p1816_p8 = pnand %p1815_p9, %p1809_p13 }
  0x51   : > { %1819 = shalt.err (!%p1816_p8)
}
  0x52   : > { %s1820_s12 = scalar_lea.vmem %s2048_s19, 2048  ;;  %s1881_s17 = smov [#allocation3]  }
  0x53   : > { %p1821_p1 = scmp.ne.s32.totalorder %s2048_s19, %s1820_s12  ;;  %s1825_s14 = sshll.u32 %s1881_s17, 4  ;;  %s1826_s14 = int_to_ptr.vmem [resolvable:$false] %s1825_s14 }
  0x54   : > { %s1827_s25 = scalar_lea.vmem %s1826_s14, 4096  ;;  %p1828_p10 = scmp.lt.s32.totalorder %s2048_s19, %s1826_s14 }
  0x55   : > { %p1823_p4 = pnand %p1821_p1, %p1807_p11  ;;  %p1829_p12 = scmp.lt.s32.totalorder %s1827_s25, %s1820_s12 }
  0x57   : > { %p1824_p5 = pneg %p1823_p4  ;;  %p1830_p0 = por %p1829_p12, %p1828_p10 }
  0x59   : > { %p1831_p2 = pnand %p1830_p0, %p1824_p5 }
  0x5b   : > { %1834 = shalt.err (!%p1831_p2)
}
  0x5c   : > { %1648 = dma.hbm_to_vmem [thread:$0]  (!%p2044_p7), %s2042_s18, 2048, %s2048_s19, %s2050_s22, %s1879_s20, %s1879_s20, %s1880_s21  }
  0x5d   : > { %p2406_p11 = scmp.ne.s32.totalorder %s2403_s9, 0 }
  0x5e   : > { %s282_s23 = sand.u32 (!%p2406_p11), 1, %s1865_s27   ;;  %p2407_p13 = scmp.ne.s32.totalorder (!%p2406_p11), %s2402_s8, 0 }
  0x5f   : > { %280 = sbr.rel (%p2406_p11) target bundleno = 849 (0x351), region = 48  ;;  %s1457_s26 = sshll.u32 (!%p2406_p11), %s282_s23, 7 }
  0x60   : > { %s283_s13 = scalar_lea.sflag (!%p2406_p11), [#allocation4], %s282_s23  ;;  %s2084_s15 = scalar_lea.vmem (!%p2406_p11), [#allocation3], %s1457_s26 }
  0x66   : > { %1852 = dma.done.wait (%p2407_p13), %s283_s13, 2048  }
  0x67   : > { %1854 = vsyncadd (%p2407_p13), %s283_s13, 4294965248  ;;  %p2408_p3 = scmp.ne.s32.totalorder %s2401_s30, 0 }
  0x69   : > { %1856 = dma.done.wait (%p2408_p3), [#allocation6], 4096  }
  0x6a   : > { %1858 = vsyncadd (%p2408_p3), [#allocation6], 4294963200  ;;  %v1882_v1 = vmov 0   ;;  %v1693_v2 = vld [vmem:[#allocation5 + $0x4] ss:$8 sps:$4 sm:$0xff]   ;;  %v1737_v23 = vld [vmem:[#allocation7 + $0x50] sm:$0xff]   ;;  %v383_v50 = vlaneseq }
  0x6b   : > { %601 = vmatprep.mubr.bf16.mxu0 %v1882_v1  ;;  %v1695_v3 = vld [vmem:[#allocation5] ss:$8 sps:$4 sm:$0xff]   ;;  %569 = vmatprep.subr.bf16.mxu0 %v1693_v2  ;;  %v1696_v4 = vld [vmem:[#allocation5 + $0x14] ss:$8 sps:$4 sm:$0xff]   ;;  %v1698_v5 = vld [vmem:[#allocation5 + $0x10] ss:$8 sps:$4 sm:$0xff]  }
  0x6c   : > { %570 = vmatpush1.bf16.msra.mxu0 %v1695_v3  ;;  %v1699_v6 = vld [vmem:[#allocation5 + $0x24] ss:$8 sps:$4 sm:$0xff]   ;;  %v1701_v7 = vld [vmem:[#allocation5 + $0x20] ss:$8 sps:$4 sm:$0xff]   ;;  %v1702_v8 = vld [vmem:[#allocation5 + $0x34] ss:$8 sps:$4 sm:$0xff]  }
  0x6d   : > { %571 = vmatprep.subr.bf16.mxu0 %v1696_v4  ;;  %v1704_v9 = vld [vmem:[#allocation5 + $0x30] ss:$8 sps:$4 sm:$0xff]   ;;  %v1705_v10 = vld [vmem:[#allocation5 + $0x44] ss:$8 sps:$4 sm:$0xff]   ;;  %v1707_v11 = vld [vmem:[#allocation5 + $0x40] ss:$8 sps:$4 sm:$0xff]  }
  0x6e   : > { %v1708_v12 = vld [vmem:[#allocation5 + $0x54] ss:$8 sps:$4 sm:$0xff]   ;;  %v1710_v13 = vld [vmem:[#allocation5 + $0x50] ss:$8 sps:$4 sm:$0xff]   ;;  %v1711_v14 = vld [vmem:[#allocation5 + $0x64] ss:$8 sps:$4 sm:$0xff]  }
  0x6f   : > { %v1713_v15 = vld [vmem:[#allocation5 + $0x60] ss:$8 sps:$4 sm:$0xff]   ;;  %v1714_v16 = vld [vmem:[#allocation5 + $0x74] ss:$8 sps:$4 sm:$0xff]   ;;  %v1716_v17 = vld [vmem:[#allocation5 + $0x70] ss:$8 sps:$4 sm:$0xff]  }
  0x70   : > { %572 = vmatpush1.bf16.msra.mxu0 %v1698_v5  ;;  %v1733_v18 = vld [vmem:[#allocation7 + $0x40] sm:$0xff]   ;;  %v1735_v21 = vld [vmem:[#allocation7 + $0x48] sm:$0xff]   ;;  %v1738_v24 = vld [vmem:[#allocation7 + $0x10] sm:$0xff]   ;;  %v384_v51 = vshrl.u32 %v383_v50, 7  ;;  %s1460_s19 = sshll.u32 %s1447_s6, 5  ;;  %vm1328_vm0 = vcmask 7168  }
  0x71   : > { %573 = vmatprep.subr.bf16.mxu0 %v1699_v6  ;;  %v1717_v19 = vld [vmem:[%s2084_s15] sm:$0xff]   ;;  %1516 = vmatprep.subr.bf16.mxu1 %v1733_v18  ;;  %v1736_v22 = vld [vmem:[#allocation7 + $0x8] sm:$0xff]   ;;  %v1739_v25 = vld [vmem:[#allocation7 + $0x58] sm:$0xff]   ;;  %p327_p7 = scmp.lt.s32.totalorder %s1460_s19, 63 }
  0x72   : > { %v1734_v20 = vld [vmem:[#allocation7] sm:$0xff]   ;;  %v1718_v26 = vld [vmem:[%s2084_s15 + $0x8] sm:$0xff]   ;;  %v1740_v27 = vld [vmem:[#allocation7 + $0x18] sm:$0xff]   ;;  %v385_v52 = vsub.s32 0, %v384_v51  ;;  %v389_v54 = vsub.s32 1, %v384_v51 }
  0x73   : > { %1517 = vmatpush3.bf16.msra.mxu1 %v1734_v20  ;;  %v1741_v28 = vld [vmem:[#allocation7 + $0x60] sm:$0xff]   ;;  %v1743_v30 = vld [vmem:[#allocation7 + $0x68] sm:$0xff]   ;;  %v1719_v31 = vld [vmem:[%s2084_s15 + $0x10] sm:$0xff]   ;;  %s2414_s19 = smov (!%p327_p7, %s1460_s19), 63 }
  0x74   : > { %574 = vmatpush1.bf16.msra.mxu0 %v1701_v7  ;;  %1518 = vmatprep.subr.bf16.mxu1 %v1735_v21  ;;  %v1742_v29 = vld [vmem:[#allocation7 + $0x20] sm:$0xff]   ;;  %v1720_v32 = vld [vmem:[%s2084_s15 + $0x18] sm:$0xff]   ;;  %v1722_v34 = vld [vmem:[%s2084_s15 + $0x28] sm:$0xff]   ;;  %s1461_s11 = sshll.u32 %s2414_s19, 3 }
  0x75   : > { %575 = vmatprep.subr.bf16.mxu0 %v1702_v8  ;;  %v1721_v33 = vld [vmem:[%s2084_s15 + $0x20] sm:$0xff]   ;;  %v1723_v35 = vld [vmem:[%s2084_s15 + $0x30] sm:$0xff]   ;;  %v1724_v36 = vld [vmem:[%s2084_s15 + $0x38] sm:$0xff]   ;;  %s2278_s12 = scalar_lea.vmem %s2396_s7, %s1461_s11 }
  0x76   : > { %v1725_v37 = vld [vmem:[%s2084_s15 + $0x40] sm:$0xff]   ;;  %v1726_v38 = vld [vmem:[%s2084_s15 + $0x48] sm:$0xff]   ;;  %v1727_v39 = vld [vmem:[%s2084_s15 + $0x50] sm:$0xff]  }
  0x77   : > { %1519 = vmatpush3.bf16.msra.mxu1 %v1736_v22  ;;  %v1744_v40 = vld [vmem:[#allocation7 + $0x28] sm:$0xff]   ;;  %v1728_v41 = vld [vmem:[%s2084_s15 + $0x58] sm:$0xff]   ;;  %v1745_v42 = vld [vmem:[#allocation7 + $0x70] sm:$0xff]  }
  0x78   : > { %576 = vmatpush1.bf16.msra.mxu0 %v1704_v9  ;;  %1520 = vmatprep.subr.bf16.mxu1 %v1737_v23  ;;  %v1746_v43 = vld [vmem:[#allocation7 + $0x30] sm:$0xff]   ;;  %v1747_v44 = vld [vmem:[#allocation7 + $0x78] sm:$0xff]   ;;  %v1729_v46 = vld [vmem:[%s2084_s15 + $0x60] sm:$0xff]  }
  0x79   : > { %577 = vmatprep.subr.bf16.mxu0 %v1705_v10  ;;  %v1748_v45 = vld [vmem:[#allocation7 + $0x38] sm:$0xff]   ;;  %v1730_v47 = vld [vmem:[%s2084_s15 + $0x68] sm:$0xff]   ;;  %v1731_v48 = vld [vmem:[%s2084_s15 + $0x70] sm:$0xff]  }
  0x7a   : > { %v1732_v49 = vld [vmem:[%s2084_s15 + $0x78] sm:$0xff]  }
  0x7b   : > { %1521 = vmatpush3.bf16.msra.mxu1 %v1738_v24  ;;  %v381_v53 = vld [vmem:[%s2391_s2] sm:$0x3] }
  0x7c   : > { %578 = vmatpush1.bf16.msra.mxu0 %v1707_v11  ;;  %1522 = vmatprep.subr.bf16.mxu1 %v1739_v25  ;;  %v2129_v55 = vrot.slane %v381_v53, %v385_v52  ;;  %v2131_v56 = vrot.slane %v381_v53, %v389_v54 }
  0x7d   : > { %579 = vmatprep.subr.bf16.mxu0 %v1708_v12 }
  0x7f   : > { %1523 = vmatpush3.bf16.msra.mxu1 %v1740_v27 }
  0x80   : > { %580 = vmatpush1.bf16.msra.mxu0 %v1710_v13  ;;  %1524 = vmatprep.subr.bf16.mxu1 %v1741_v28 }
  0x81   : > { %581 = vmatprep.subr.bf16.mxu0 %v1711_v14 }
  0x83   : > { %1525 = vmatpush3.bf16.msra.mxu1 %v1742_v29 }
  0x84   : > { %582 = vmatpush1.bf16.msra.mxu0 %v1713_v15  ;;  %1526 = vmatprep.subr.bf16.mxu1 %v1743_v30 }
  0x85   : > { %583 = vmatprep.subr.bf16.mxu0 %v1714_v16 }
  0x87   : > { %1527 = vmatpush3.bf16.msra.mxu1 %v1744_v40 }
  0x88   : > { %584 = vmatpush1.bf16.msra.mxu0 %v1716_v17  ;;  %1528 = vmatprep.subr.bf16.mxu1 %v1745_v42 }
  0x8b   : > { %602 = vmatmul.mubr.bf16.vlgmr.msra.gmra.mrb[0].mxu0 %v1717_v19  ;;  %1529 = vmatpush3.bf16.msra.mxu1 %v1746_v43 }
  0x8c   : > { %611 = vmatprep.mubr.bf16.mxu0 %v1882_v1  ;;  %1530 = vmatprep.subr.bf16.mxu1 %v1747_v44 }
  0x8f   : > { %1531 = vmatpush3.bf16.msra.mxu1 %v1748_v45 }
  0x93   : > { %612 = vmatmul.mubr.bf16.gmra.mrb[4].mxu0 %v1718_v26 }
  0x94   : > { %621 = vmatprep.mubr.bf16.mxu0 %v1882_v1 }
  0x9b   : > { %622 = vmatmul.mubr.bf16.gmra.mrb[8].mxu0 %v1719_v31 }
  0x9c   : > { %631 = vmatprep.mubr.bf16.mxu0 %v1882_v1 }
  0xa3   : > { %632 = vmatmul.mubr.bf16.gmra.mrb[12].mxu0 %v1720_v32 }
  0xa4   : > { %641 = vmatprep.mubr.bf16.mxu0 %v1882_v1 }
  0xab   : > { %642 = vmatmul.mubr.bf16.gmra.mrb[16].mxu0 %v1721_v33 }
  0xac   : > { %651 = vmatprep.mubr.bf16.mxu0 %v1882_v1 }
  0xb3   : > { %652 = vmatmul.mubr.bf16.gmra.mrb[20].mxu0 %v1722_v34 }
  0xb4   : > { %661 = vmatprep.mubr.bf16.mxu0 %v1882_v1 }
  0xbb   : > { %662 = vmatmul.mubr.bf16.gmra.mrb[24].mxu0 %v1723_v35 }
  0xbc   : > { %671 = vmatprep.mubr.bf16.mxu0 %v1882_v1 }
  0xc3   : > { %672 = vmatmul.mubr.bf16.gmra.mrb[28].mxu0 %v1724_v36 }
  0xc4   : > { %681 = vmatprep.mubr.bf16.mxu0 %v1882_v1 }
  0xcb   : > { %682 = vmatmul.mubr.bf16.gmra.mrb[32].mxu0 %v1725_v37 }
  0xcc   : > { %691 = vmatprep.mubr.bf16.mxu0 %v1882_v1 }
  0xd3   : > { %692 = vmatmul.mubr.bf16.gmra.mrb[36].mxu0 %v1726_v38 }
  0xd4   : > { %701 = vmatprep.mubr.bf16.mxu0 %v1882_v1 }
  0xdb   : > { %702 = vmatmul.mubr.bf16.gmra.mrb[40].mxu0 %v1727_v39 }
  0xdc   : > { %711 = vmatprep.mubr.bf16.mxu0 %v1882_v1 }
  0xe3   : > { %712 = vmatmul.mubr.bf16.gmra.mrb[44].mxu0 %v1728_v41 }
  0xe4   : > { %721 = vmatprep.mubr.bf16.mxu0 %v1882_v1 }
  0xeb   : > { %722 = vmatmul.mubr.bf16.gmra.mrb[48].mxu0 %v1729_v46 }
  0xec   : > { %731 = vmatprep.mubr.bf16.mxu0 %v1882_v1 }
  0xf3   : > { %732 = vmatmul.mubr.bf16.gmra.mrb[52].mxu0 %v1730_v47 }
  0xf4   : > { %741 = vmatprep.mubr.bf16.mxu0 %v1882_v1 }
  0xfb   : > { %742 = vmatmul.mubr.bf16.gmra.mrb[56].mxu0 %v1731_v48 }
  0xfc   : > { %751 = vmatprep.mubr.bf16.mxu0 %v1882_v1 }
 0x103   : > { %752 = vmatmul.mubr.bf16.gmra.mrb[60].mxu0 %v1732_v49 }
 0x15e   : > { %v603_v57 = vpop.f32.mrb[0].mxu0 }
 0x15f   : > { %v604_v58 = vadd.f32 %v603_v57, %v2129_v55  ;;  %v605_v59 = vpop.f32.mrb[1].mxu0 }
 0x160   : > { %v606_v60 = vadd.f32 %v605_v59, %v2131_v56  ;;  %v607_v61 = vpop.f32.mrb[2].mxu0 }
 0x161   : > { %v608_v62 = vadd.f32 %v607_v61, %v2129_v55  ;;  %v609_v63 = vpop.f32.mrb[3].mxu0  ;;  %v762_v1 = vmax.f32 %v604_v58, 0.0 }
 0x162   : > { %v610_v0 = vadd.f32 %v609_v63, %v2131_v56  ;;  %v763_v3 = vmax.f32 %v606_v60, 0.0 }
 0x163   : > { %v764_v2 = vmax.f32 %v608_v62, 0.0 }
 0x164   : > { %v765_v4 = vmax.f32 %v610_v0, 0.0 }
 0x165   : > { %v826_v5 = vpack.c.bf16 %v764_v2, %v762_v1 }
 0x166   : > { %v613_v6 = vpop.f32.mrb[4].mxu0  ;;  %v827_v7 = vpack.c.bf16 %v765_v4, %v763_v3 }
 0x167   : > { %v614_v8 = vadd.f32 %v613_v6, %v2129_v55  ;;  %v615_v9 = vpop.f32.mrb[5].mxu0 }
 0x168   : > { %v616_v10 = vadd.f32 %v615_v9, %v2131_v56  ;;  %v617_v11 = vpop.f32.mrb[6].mxu0  ;;  %1025 = vmatprep.mubr.bf16.mxu1 %v827_v7 }
 0x169   : > { %v618_v12 = vadd.f32 %v617_v11, %v2129_v55  ;;  %v619_v13 = vpop.f32.mrb[7].mxu0  ;;  %1026 = vmatmul.mubr.bf16.vlgmr.msra.gmra.mrb[0].mxu1 %v826_v5  ;;  %v766_v15 = vmax.f32 %v614_v8, 0.0 }
 0x16a   : > { %v620_v14 = vadd.f32 %v619_v13, %v2131_v56  ;;  %v767_v17 = vmax.f32 %v616_v10, 0.0 }
 0x16b   : > { %v768_v16 = vmax.f32 %v618_v12, 0.0 }
 0x16c   : > { %v769_v18 = vmax.f32 %v620_v14, 0.0 }
 0x16d   : > { %v828_v19 = vpack.c.bf16 %v768_v16, %v766_v15 }
 0x16e   : > { %v829_v20 = vpack.c.bf16 %v769_v18, %v767_v17  ;;  %v623_v21 = vpop.f32.mrb[8].mxu0 }
 0x16f   : > { %v624_v22 = vadd.f32 %v623_v21, %v2129_v55  ;;  %v625_v23 = vpop.f32.mrb[9].mxu0 }
 0x170   : > { %v626_v24 = vadd.f32 %v625_v23, %v2131_v56  ;;  %v627_v25 = vpop.f32.mrb[10].mxu0  ;;  %1033 = vmatprep.mubr.bf16.mxu1 %v829_v20 }
 0x171   : > { %v628_v26 = vadd.f32 %v627_v25, %v2129_v55  ;;  %v629_v27 = vpop.f32.mrb[11].mxu0  ;;  %1034 = vmatmul.mubr.bf16.gmra.mrb[4].mxu1 %v828_v19  ;;  %v770_v29 = vmax.f32 %v624_v22, 0.0 }
 0x172   : > { %v630_v28 = vadd.f32 %v629_v27, %v2131_v56  ;;  %v771_v31 = vmax.f32 %v626_v24, 0.0 }
 0x173   : > { %v772_v30 = vmax.f32 %v628_v26, 0.0 }
 0x174   : > { %v773_v32 = vmax.f32 %v630_v28, 0.0 }
 0x175   : > { %v830_v33 = vpack.c.bf16 %v772_v30, %v770_v29 }
 0x176   : > { %v831_v34 = vpack.c.bf16 %v773_v32, %v771_v31  ;;  %v633_v35 = vpop.f32.mrb[12].mxu0 }
 0x177   : > { %v634_v36 = vadd.f32 %v633_v35, %v2129_v55  ;;  %v635_v37 = vpop.f32.mrb[13].mxu0 }
 0x178   : > { %v636_v38 = vadd.f32 %v635_v37, %v2131_v56  ;;  %v637_v39 = vpop.f32.mrb[14].mxu0  ;;  %1041 = vmatprep.mubr.bf16.mxu1 %v831_v34 }
 0x179   : > { %v638_v40 = vadd.f32 %v637_v39, %v2129_v55  ;;  %v639_v41 = vpop.f32.mrb[15].mxu0  ;;  %1042 = vmatmul.mubr.bf16.gmra.mrb[8].mxu1 %v830_v33  ;;  %v774_v43 = vmax.f32 %v634_v36, 0.0 }
 0x17a   : > { %v640_v42 = vadd.f32 %v639_v41, %v2131_v56  ;;  %v775_v45 = vmax.f32 %v636_v38, 0.0 }
 0x17b   : > { %v776_v44 = vmax.f32 %v638_v40, 0.0 }
 0x17c   : > { %v777_v46 = vmax.f32 %v640_v42, 0.0 }
 0x17d   : > { %v832_v47 = vpack.c.bf16 %v776_v44, %v774_v43 }
 0x17e   : > { %v833_v48 = vpack.c.bf16 %v777_v46, %v775_v45  ;;  %v643_v49 = vpop.f32.mrb[16].mxu0 }
 0x17f   : > { %v644_v50 = vadd.f32 %v643_v49, %v2129_v55  ;;  %v645_v51 = vpop.f32.mrb[17].mxu0 }
 0x180   : > { %v646_v52 = vadd.f32 %v645_v51, %v2131_v56  ;;  %v647_v53 = vpop.f32.mrb[18].mxu0  ;;  %1049 = vmatprep.mubr.bf16.mxu1 %v833_v48 }
 0x181   : > { %v648_v54 = vadd.f32 %v647_v53, %v2129_v55  ;;  %v649_v57 = vpop.f32.mrb[19].mxu0  ;;  %1050 = vmatmul.mubr.bf16.gmra.mrb[12].mxu1 %v832_v47  ;;  %v778_v59 = vmax.f32 %v644_v50, 0.0 }
 0x182   : > { %v650_v58 = vadd.f32 %v649_v57, %v2131_v56  ;;  %v779_v61 = vmax.f32 %v646_v52, 0.0 }
 0x183   : > { %v780_v60 = vmax.f32 %v648_v54, 0.0 }
 0x184   : > { %v781_v62 = vmax.f32 %v650_v58, 0.0 }
 0x185   : > { %v834_v63 = vpack.c.bf16 %v780_v60, %v778_v59 }
 0x186   : > { %v835_v0 = vpack.c.bf16 %v781_v62, %v779_v61  ;;  %v653_v1 = vpop.f32.mrb[20].mxu0 }
 0x187   : > { %v654_v2 = vadd.f32 %v653_v1, %v2129_v55  ;;  %v655_v3 = vpop.f32.mrb[21].mxu0 }
 0x188   : > { %v656_v4 = vadd.f32 %v655_v3, %v2131_v56  ;;  %v657_v5 = vpop.f32.mrb[22].mxu0  ;;  %1057 = vmatprep.mubr.bf16.mxu1 %v835_v0 }
 0x189   : > { %v658_v6 = vadd.f32 %v657_v5, %v2129_v55  ;;  %v659_v7 = vpop.f32.mrb[23].mxu0  ;;  %1058 = vmatmul.mubr.bf16.gmra.mrb[16].mxu1 %v834_v63  ;;  %v782_v9 = vmax.f32 %v654_v2, 0.0 }
 0x18a   : > { %v660_v8 = vadd.f32 %v659_v7, %v2131_v56  ;;  %v783_v11 = vmax.f32 %v656_v4, 0.0 }
 0x18b   : > { %v784_v10 = vmax.f32 %v658_v6, 0.0 }
 0x18c   : > { %v785_v12 = vmax.f32 %v660_v8, 0.0 }
 0x18d   : > { %v836_v13 = vpack.c.bf16 %v784_v10, %v782_v9 }
 0x18e   : > { %v837_v14 = vpack.c.bf16 %v785_v12, %v783_v11  ;;  %v663_v15 = vpop.f32.mrb[24].mxu0 }
 0x18f   : > { %v664_v16 = vadd.f32 %v663_v15, %v2129_v55  ;;  %v665_v17 = vpop.f32.mrb[25].mxu0 }
 0x190   : > { %v666_v18 = vadd.f32 %v665_v17, %v2131_v56  ;;  %v667_v19 = vpop.f32.mrb[26].mxu0  ;;  %1065 = vmatprep.mubr.bf16.mxu1 %v837_v14 }
 0x191   : > { %v668_v20 = vadd.f32 %v667_v19, %v2129_v55  ;;  %v669_v21 = vpop.f32.mrb[27].mxu0  ;;  %1066 = vmatmul.mubr.bf16.gmra.mrb[20].mxu1 %v836_v13  ;;  %v786_v23 = vmax.f32 %v664_v16, 0.0 }
 0x192   : > { %v670_v22 = vadd.f32 %v669_v21, %v2131_v56  ;;  %v787_v25 = vmax.f32 %v666_v18, 0.0 }
 0x193   : > { %v788_v24 = vmax.f32 %v668_v20, 0.0 }
 0x194   : > { %v789_v26 = vmax.f32 %v670_v22, 0.0 }
 0x195   : > { %v838_v27 = vpack.c.bf16 %v788_v24, %v786_v23 }
 0x196   : > { %v839_v28 = vpack.c.bf16 %v789_v26, %v787_v25  ;;  %v673_v29 = vpop.f32.mrb[28].mxu0 }
 0x197   : > { %v674_v30 = vadd.f32 %v673_v29, %v2129_v55  ;;  %v675_v31 = vpop.f32.mrb[29].mxu0 }
 0x198   : > { %v676_v32 = vadd.f32 %v675_v31, %v2131_v56  ;;  %v677_v33 = vpop.f32.mrb[30].mxu0  ;;  %1073 = vmatprep.mubr.bf16.mxu1 %v839_v28 }
 0x199   : > { %v678_v34 = vadd.f32 %v677_v33, %v2129_v55  ;;  %v679_v35 = vpop.f32.mrb[31].mxu0  ;;  %1074 = vmatmul.mubr.bf16.gmra.mrb[24].mxu1 %v838_v27  ;;  %v790_v37 = vmax.f32 %v674_v30, 0.0 }
 0x19a   : > { %v680_v36 = vadd.f32 %v679_v35, %v2131_v56  ;;  %v791_v39 = vmax.f32 %v676_v32, 0.0 }
 0x19b   : > { %v792_v38 = vmax.f32 %v678_v34, 0.0 }
 0x19c   : > { %v793_v40 = vmax.f32 %v680_v36, 0.0 }
 0x19d   : > { %v840_v41 = vpack.c.bf16 %v792_v38, %v790_v37 }
 0x19e   : > { %v841_v42 = vpack.c.bf16 %v793_v40, %v791_v39  ;;  %v683_v43 = vpop.f32.mrb[32].mxu0 }
 0x19f   : > { %v684_v44 = vadd.f32 %v683_v43, %v2129_v55  ;;  %v685_v45 = vpop.f32.mrb[33].mxu0 }
 0x1a0   : > { %v686_v46 = vadd.f32 %v685_v45, %v2131_v56  ;;  %v687_v47 = vpop.f32.mrb[34].mxu0  ;;  %1081 = vmatprep.mubr.bf16.mxu1 %v841_v42 }
 0x1a1   : > { %v688_v48 = vadd.f32 %v687_v47, %v2129_v55  ;;  %v689_v49 = vpop.f32.mrb[35].mxu0  ;;  %1082 = vmatmul.mubr.bf16.gmra.mrb[28].mxu1 %v840_v41  ;;  %v794_v51 = vmax.f32 %v684_v44, 0.0 }
 0x1a2   : > { %v690_v50 = vadd.f32 %v689_v49, %v2131_v56  ;;  %v795_v53 = vmax.f32 %v686_v46, 0.0 }
 0x1a3   : > { %v796_v52 = vmax.f32 %v688_v48, 0.0 }
 0x1a4   : > { %v797_v54 = vmax.f32 %v690_v50, 0.0 }
 0x1a5   : > { %v842_v57 = vpack.c.bf16 %v796_v52, %v794_v51 }
 0x1a6   : > { %v843_v58 = vpack.c.bf16 %v797_v54, %v795_v53  ;;  %v693_v59 = vpop.f32.mrb[36].mxu0 }
 0x1a7   : > { %v694_v60 = vadd.f32 %v693_v59, %v2129_v55  ;;  %v695_v61 = vpop.f32.mrb[37].mxu0 }
 0x1a8   : > { %v696_v62 = vadd.f32 %v695_v61, %v2131_v56  ;;  %v697_v63 = vpop.f32.mrb[38].mxu0  ;;  %1089 = vmatprep.mubr.bf16.mxu1 %v843_v58 }
 0x1a9   : > { %v698_v0 = vadd.f32 %v697_v63, %v2129_v55  ;;  %v699_v1 = vpop.f32.mrb[39].mxu0  ;;  %1090 = vmatmul.mubr.bf16.gmra.mrb[32].mxu1 %v842_v57  ;;  %v798_v3 = vmax.f32 %v694_v60, 0.0 }
 0x1aa   : > { %v700_v2 = vadd.f32 %v699_v1, %v2131_v56  ;;  %v799_v5 = vmax.f32 %v696_v62, 0.0 }
 0x1ab   : > { %v800_v4 = vmax.f32 %v698_v0, 0.0 }
 0x1ac   : > { %v801_v6 = vmax.f32 %v700_v2, 0.0 }
 0x1ad   : > { %v844_v7 = vpack.c.bf16 %v800_v4, %v798_v3 }
 0x1ae   : > { %v845_v8 = vpack.c.bf16 %v801_v6, %v799_v5  ;;  %v703_v9 = vpop.f32.mrb[40].mxu0 }
 0x1af   : > { %v704_v10 = vadd.f32 %v703_v9, %v2129_v55  ;;  %v705_v11 = vpop.f32.mrb[41].mxu0 }
 0x1b0   : > { %v706_v12 = vadd.f32 %v705_v11, %v2131_v56  ;;  %v707_v13 = vpop.f32.mrb[42].mxu0  ;;  %1097 = vmatprep.mubr.bf16.mxu1 %v845_v8 }
 0x1b1   : > { %v708_v14 = vadd.f32 %v707_v13, %v2129_v55  ;;  %v709_v15 = vpop.f32.mrb[43].mxu0  ;;  %1098 = vmatmul.mubr.bf16.gmra.mrb[36].mxu1 %v844_v7  ;;  %v802_v17 = vmax.f32 %v704_v10, 0.0 }
 0x1b2   : > { %v710_v16 = vadd.f32 %v709_v15, %v2131_v56  ;;  %v803_v19 = vmax.f32 %v706_v12, 0.0 }
 0x1b3   : > { %v804_v18 = vmax.f32 %v708_v14, 0.0 }
 0x1b4   : > { %v805_v20 = vmax.f32 %v710_v16, 0.0 }
 0x1b5   : > { %v846_v21 = vpack.c.bf16 %v804_v18, %v802_v17 }
 0x1b6   : > { %v847_v22 = vpack.c.bf16 %v805_v20, %v803_v19  ;;  %v713_v23 = vpop.f32.mrb[44].mxu0 }
 0x1b7   : > { %v714_v24 = vadd.f32 %v713_v23, %v2129_v55  ;;  %v715_v25 = vpop.f32.mrb[45].mxu0 }
 0x1b8   : > { %v716_v26 = vadd.f32 %v715_v25, %v2131_v56  ;;  %v717_v27 = vpop.f32.mrb[46].mxu0  ;;  %1105 = vmatprep.mubr.bf16.mxu1 %v847_v22 }
 0x1b9   : > { %v718_v28 = vadd.f32 %v717_v27, %v2129_v55  ;;  %v719_v29 = vpop.f32.mrb[47].mxu0  ;;  %1106 = vmatmul.mubr.bf16.gmra.mrb[40].mxu1 %v846_v21  ;;  %v806_v31 = vmax.f32 %v714_v24, 0.0 }
 0x1ba   : > { %v720_v30 = vadd.f32 %v719_v29, %v2131_v56  ;;  %v807_v33 = vmax.f32 %v716_v26, 0.0 }
 0x1bb   : > { %v808_v32 = vmax.f32 %v718_v28, 0.0 }
 0x1bc   : > { %v809_v34 = vmax.f32 %v720_v30, 0.0 }
 0x1bd   : > { %v848_v35 = vpack.c.bf16 %v808_v32, %v806_v31 }
 0x1be   : > { %v849_v36 = vpack.c.bf16 %v809_v34, %v807_v33  ;;  %v723_v37 = vpop.f32.mrb[48].mxu0  ;;  %v2200_v33 = vld [vmem:[%s2393_s4] ss:$0 sm:$0xff] }
 0x1bf   : > { %v724_v38 = vadd.f32 %v723_v37, %v2129_v55  ;;  %v725_v39 = vpop.f32.mrb[49].mxu0  ;;  %v2206_v37 = vld [vmem:[%s2394_s5] ss:$0 sm:$0xff] }
 0x1c0   : > { %v726_v40 = vadd.f32 %v725_v39, %v2131_v56  ;;  %v727_v41 = vpop.f32.mrb[50].mxu0  ;;  %1113 = vmatprep.mubr.bf16.mxu1 %v849_v36 }
 0x1c1   : > { %v728_v42 = vadd.f32 %v727_v41, %v2129_v55  ;;  %v729_v43 = vpop.f32.mrb[51].mxu0  ;;  %1114 = vmatmul.mubr.bf16.gmra.mrb[44].mxu1 %v848_v35  ;;  %v810_v45 = vmax.f32 %v724_v38, 0.0 }
 0x1c2   : > { %v730_v44 = vadd.f32 %v729_v43, %v2131_v56  ;;  %v811_v47 = vmax.f32 %v726_v40, 0.0 }
 0x1c3   : > { %v812_v46 = vmax.f32 %v728_v42, 0.0 }
 0x1c4   : > { %v813_v48 = vmax.f32 %v730_v44, 0.0 }
 0x1c5   : > { %v850_v49 = vpack.c.bf16 %v812_v46, %v810_v45 }
 0x1c6   : > { %v851_v50 = vpack.c.bf16 %v813_v48, %v811_v47  ;;  %v733_v51 = vpop.f32.mrb[52].mxu0 }
 0x1c7   : > { %v734_v52 = vadd.f32 %v733_v51, %v2129_v55  ;;  %v735_v53 = vpop.f32.mrb[53].mxu0 }
 0x1c8   : > { %v736_v54 = vadd.f32 %v735_v53, %v2131_v56  ;;  %v737_v57 = vpop.f32.mrb[54].mxu0  ;;  %1121 = vmatprep.mubr.bf16.mxu1 %v851_v50 }
 0x1c9   : > { %v738_v58 = vadd.f32 %v737_v57, %v2129_v55  ;;  %v739_v59 = vpop.f32.mrb[55].mxu0  ;;  %1122 = vmatmul.mubr.bf16.gmra.mrb[48].mxu1 %v850_v49  ;;  %v814_v61 = vmax.f32 %v734_v52, 0.0 }
 0x1ca   : > { %v740_v60 = vadd.f32 %v739_v59, %v2131_v56  ;;  %v815_v63 = vmax.f32 %v736_v54, 0.0 }
 0x1cb   : > { %v816_v62 = vmax.f32 %v738_v58, 0.0 }
 0x1cc   : > { %v817_v0 = vmax.f32 %v740_v60, 0.0 }
 0x1cd   : > { %v852_v1 = vpack.c.bf16 %v816_v62, %v814_v61 }
 0x1ce   : > { %v853_v2 = vpack.c.bf16 %v817_v0, %v815_v63  ;;  %v743_v3 = vpop.f32.mrb[56].mxu0 }
 0x1cf   : > { %v744_v4 = vadd.f32 %v743_v3, %v2129_v55  ;;  %v745_v5 = vpop.f32.mrb[57].mxu0 }
 0x1d0   : > { %v746_v6 = vadd.f32 %v745_v5, %v2131_v56  ;;  %v747_v7 = vpop.f32.mrb[58].mxu0  ;;  %1129 = vmatprep.mubr.bf16.mxu1 %v853_v2 }
 0x1d1   : > { %v748_v8 = vadd.f32 %v747_v7, %v2129_v55  ;;  %v749_v9 = vpop.f32.mrb[59].mxu0  ;;  %1130 = vmatmul.mubr.bf16.gmra.mrb[52].mxu1 %v852_v1  ;;  %v818_v11 = vmax.f32 %v744_v4, 0.0 }
 0x1d2   : > { %v750_v10 = vadd.f32 %v749_v9, %v2131_v56  ;;  %v819_v13 = vmax.f32 %v746_v6, 0.0 }
 0x1d3   : > { %v820_v12 = vmax.f32 %v748_v8, 0.0 }
 0x1d4   : > { %v821_v14 = vmax.f32 %v750_v10, 0.0 }
 0x1d5   : > { %v854_v15 = vpack.c.bf16 %v820_v12, %v818_v11 }
 0x1d6   : > { %v855_v16 = vpack.c.bf16 %v821_v14, %v819_v13  ;;  %v753_v17 = vpop.f32.mrb[60].mxu0 }
 0x1d7   : > { %v754_v18 = vadd.f32 %v753_v17, %v2129_v55  ;;  %v755_v19 = vpop.f32.mrb[61].mxu0 }
 0x1d8   : > { %v756_v20 = vadd.f32 %v755_v19, %v2131_v56  ;;  %v757_v21 = vpop.f32.mrb[62].mxu0  ;;  %1137 = vmatprep.mubr.bf16.mxu1 %v855_v16 }
 0x1d9   : > { %v758_v22 = vadd.f32 %v757_v21, %v2129_v55  ;;  %v759_v23 = vpop.f32.mrb[63].mxu0  ;;  %1138 = vmatmul.mubr.bf16.gmra.mrb[56].mxu1 %v854_v15  ;;  %v822_v25 = vmax.f32 %v754_v18, 0.0 }
 0x1da   : > { %v760_v24 = vadd.f32 %v759_v23, %v2131_v56  ;;  %v823_v27 = vmax.f32 %v756_v20, 0.0 }
 0x1db   : > { %v824_v26 = vmax.f32 %v758_v22, 0.0 }
 0x1dc   : > { %v825_v28 = vmax.f32 %v760_v24, 0.0 }
 0x1dd   : > { %v856_v29 = vpack.c.bf16 %v824_v26, %v822_v25 }
 0x1de   : > { %v857_v30 = vpack.c.bf16 %v825_v28, %v823_v27 }
 0x1e0   : > { %1145 = vmatprep.mubr.bf16.mxu1 %v857_v30 }
 0x1e1   : > { %1146 = vmatmul.mubr.bf16.gmra.mrb[60].mxu1 %v856_v29 }
 0x23c   : > { %v1532_v31 = vpop.f32.mrb[0].mxu1 }
 0x23d   : > { %v1533_v32 = vpop.f32.mrb[1].mxu1 }
 0x23e   : > { %v1534_v55 = vadd.f32 %v1533_v32, %v1532_v31  ;;  %v1535_v34 = vpop.f32.mrb[2].mxu1 }
 0x23f   : > { %v1536_v35 = vpop.f32.mrb[3].mxu1 }
 0x240   : > { %v1537_v36 = vadd.f32 %v1536_v35, %v1535_v34  ;;  %v1028_v56 = vadd.f32 %v1534_v55, %v2200_v33 }
 0x242   : > { %v1031_v38 = vadd.f32 %v1537_v36, %v2200_v33  ;;  %v1154_v39 = vmax.f32 %v1028_v56, 0.0 }
 0x244   : > { %v1155_v40 = vmax.f32 %v1031_v38, 0.0  ;;  %v1538_v41 = vpop.f32.mrb[4].mxu1  ;;  %v1193_v42 = vmul.f32 %v2206_v37, %v1154_v39 }
 0x245   : > { %v1539_v43 = vpop.f32.mrb[5].mxu1 }
 0x246   : > { %v1540_v44 = vadd.f32 %v1539_v43, %v1538_v41  ;;  %v1541_v45 = vpop.f32.mrb[6].mxu1  ;;  %1225 = vadd.xlane.f32.xlu0 %v1193_v42  ;;  %v1194_v48 = vmul.f32 %v2206_v37, %v1155_v40 }
 0x247   : > { %v1542_v46 = vpop.f32.mrb[7].mxu1 }
 0x248   : > { %v1543_v47 = vadd.f32 %v1542_v46, %v1541_v45  ;;  %v1036_v49 = vadd.f32 %v1540_v44, %v2200_v33 }
 0x24a   : > { %v1039_v50 = vadd.f32 %v1543_v47, %v2200_v33  ;;  %1227 = vadd.xlane.f32.xlu0 %v1194_v48  ;;  %v1156_v51 = vmax.f32 %v1036_v49, 0.0 }
 0x24c   : > { %v1157_v52 = vmax.f32 %v1039_v50, 0.0  ;;  %v1544_v53 = vpop.f32.mrb[8].mxu1  ;;  %v1195_v54 = vmul.f32 %v2206_v37, %v1156_v51 }
 0x24d   : > { %v1545_v57 = vpop.f32.mrb[9].mxu1 }
 0x24e   : > { %v1546_v58 = vadd.f32 %v1545_v57, %v1544_v53  ;;  %v1547_v59 = vpop.f32.mrb[10].mxu1  ;;  %1229 = vadd.xlane.f32.xlu1 %v1195_v54  ;;  %v1196_v63 = vmul.f32 %v2206_v37, %v1157_v52 }
 0x24f   : > { %v1548_v60 = vpop.f32.mrb[11].mxu1 }
 0x250   : > { %v1044_v61 = vadd.f32 %v1546_v58, %v2200_v33  ;;  %v1549_v62 = vadd.f32 %v1548_v60, %v1547_v59 }
 0x252   : > { %v1158_v0 = vmax.f32 %v1044_v61, 0.0  ;;  %v1047_v1 = vadd.f32 %v1549_v62, %v2200_v33  ;;  %1231 = vadd.xlane.f32.xlu1 %v1196_v63 }
 0x254   : > { %v1159_v2 = vmax.f32 %v1047_v1, 0.0  ;;  %v1550_v3 = vpop.f32.mrb[12].mxu1  ;;  %v1197_v4 = vmul.f32 %v2206_v37, %v1158_v0 }
 0x255   : > { %v1551_v5 = vpop.f32.mrb[13].mxu1 }
 0x256   : > { %v1552_v6 = vadd.f32 %v1551_v5, %v1550_v3  ;;  %v1553_v7 = vpop.f32.mrb[14].mxu1  ;;  %1233 = vadd.xlane.f32.xlu0 %v1197_v4  ;;  %v1198_v8 = vmul.f32 %v2206_v37, %v1159_v2 }
 0x257   : > { %v1554_v9 = vpop.f32.mrb[15].mxu1 }
 0x258   : > { %v1052_v10 = vadd.f32 %v1552_v6, %v2200_v33  ;;  %v1555_v11 = vadd.f32 %v1554_v9, %v1553_v7  ;;  %1235 = vadd.xlane.f32.xlu1 %v1198_v8 }
 0x25a   : > { %v1160_v12 = vmax.f32 %v1052_v10, 0.0  ;;  %v1055_v13 = vadd.f32 %v1555_v11, %v2200_v33 }
 0x25c   : > { %v1161_v14 = vmax.f32 %v1055_v13, 0.0  ;;  %v1556_v15 = vpop.f32.mrb[16].mxu1  ;;  %v1199_v16 = vmul.f32 %v2206_v37, %v1160_v12 }
 0x25d   : > { %v1557_v17 = vpop.f32.mrb[17].mxu1 }
 0x25e   : > { %v1558_v18 = vadd.f32 %v1557_v17, %v1556_v15  ;;  %v1559_v19 = vpop.f32.mrb[18].mxu1  ;;  %1237 = vadd.xlane.f32.xlu0 %v1199_v16  ;;  %v1200_v20 = vmul.f32 %v2206_v37, %v1161_v14 }
 0x25f   : > { %v1560_v21 = vpop.f32.mrb[19].mxu1 }
 0x260   : > { %v1060_v22 = vadd.f32 %v1558_v18, %v2200_v33  ;;  %v1561_v23 = vadd.f32 %v1560_v21, %v1559_v19  ;;  %1239 = vadd.xlane.f32.xlu1 %v1200_v20 }
 0x262   : > { %v1162_v24 = vmax.f32 %v1060_v22, 0.0  ;;  %v1063_v25 = vadd.f32 %v1561_v23, %v2200_v33 }
 0x264   : > { %v1163_v26 = vmax.f32 %v1063_v25, 0.0  ;;  %v1562_v27 = vpop.f32.mrb[20].mxu1  ;;  %v1201_v28 = vmul.f32 %v2206_v37, %v1162_v24 }
 0x265   : > { %v1563_v29 = vpop.f32.mrb[21].mxu1 }
 0x266   : > { %v1564_v30 = vadd.f32 %v1563_v29, %v1562_v27  ;;  %v1565_v31 = vpop.f32.mrb[22].mxu1  ;;  %1241 = vadd.xlane.f32.xlu0 %v1201_v28  ;;  %v1202_v32 = vmul.f32 %v2206_v37, %v1163_v26 }
 0x267   : > { %v1566_v55 = vpop.f32.mrb[23].mxu1 }
 0x268   : > { %v1068_v34 = vadd.f32 %v1564_v30, %v2200_v33  ;;  %v1567_v35 = vadd.f32 %v1566_v55, %v1565_v31  ;;  %1243 = vadd.xlane.f32.xlu1 %v1202_v32 }
 0x26a   : > { %v1164_v36 = vmax.f32 %v1068_v34, 0.0  ;;  %v1071_v56 = vadd.f32 %v1567_v35, %v2200_v33 }
 0x26c   : > { %v1165_v38 = vmax.f32 %v1071_v56, 0.0  ;;  %v1568_v39 = vpop.f32.mrb[24].mxu1  ;;  %v1203_v40 = vmul.f32 %v2206_v37, %v1164_v36 }
 0x26d   : > { %v1569_v41 = vpop.f32.mrb[25].mxu1 }
 0x26e   : > { %v1570_v42 = vadd.f32 %v1569_v41, %v1568_v39  ;;  %v1571_v43 = vpop.f32.mrb[26].mxu1  ;;  %1245 = vadd.xlane.f32.xlu0 %v1203_v40  ;;  %v1204_v44 = vmul.f32 %v2206_v37, %v1165_v38 }
 0x26f   : > { %v1572_v45 = vpop.f32.mrb[27].mxu1 }
 0x270   : > { %v1076_v46 = vadd.f32 %v1570_v42, %v2200_v33  ;;  %v1573_v47 = vadd.f32 %v1572_v45, %v1571_v43  ;;  %1247 = vadd.xlane.f32.xlu1 %v1204_v44 }
 0x272   : > { %v1166_v48 = vmax.f32 %v1076_v46, 0.0  ;;  %v1079_v49 = vadd.f32 %v1573_v47, %v2200_v33 }
 0x274   : > { %v1167_v50 = vmax.f32 %v1079_v49, 0.0  ;;  %v1574_v51 = vpop.f32.mrb[28].mxu1  ;;  %v1205_v52 = vmul.f32 %v2206_v37, %v1166_v48 }
 0x275   : > { %v1575_v53 = vpop.f32.mrb[29].mxu1 }
 0x276   : > { %v1576_v54 = vadd.f32 %v1575_v53, %v1574_v51  ;;  %v1577_v57 = vpop.f32.mrb[30].mxu1  ;;  %1249 = vadd.xlane.f32.xlu0 %v1205_v52  ;;  %v1206_v58 = vmul.f32 %v2206_v37, %v1167_v50 }
 0x277   : > { %v1578_v59 = vpop.f32.mrb[31].mxu1 }
 0x278   : > { %v1084_v60 = vadd.f32 %v1576_v54, %v2200_v33  ;;  %v1579_v61 = vadd.f32 %v1578_v59, %v1577_v57  ;;  %1251 = vadd.xlane.f32.xlu1 %v1206_v58 }
 0x27a   : > { %v1168_v62 = vmax.f32 %v1084_v60, 0.0  ;;  %v1087_v63 = vadd.f32 %v1579_v61, %v2200_v33 }
 0x27c   : > { %v1169_v0 = vmax.f32 %v1087_v63, 0.0  ;;  %v1580_v1 = vpop.f32.mrb[32].mxu1  ;;  %v1207_v2 = vmul.f32 %v2206_v37, %v1168_v62 }
 0x27d   : > { %v1581_v3 = vpop.f32.mrb[33].mxu1 }
 0x27e   : > { %v1582_v4 = vadd.f32 %v1581_v3, %v1580_v1  ;;  %v1583_v5 = vpop.f32.mrb[34].mxu1  ;;  %1253 = vadd.xlane.f32.xlu0 %v1207_v2  ;;  %v1208_v6 = vmul.f32 %v2206_v37, %v1169_v0 }
 0x27f   : > { %v1584_v7 = vpop.f32.mrb[35].mxu1 }
 0x280   : > { %v1092_v8 = vadd.f32 %v1582_v4, %v2200_v33  ;;  %v1585_v9 = vadd.f32 %v1584_v7, %v1583_v5  ;;  %1255 = vadd.xlane.f32.xlu1 %v1208_v6 }
 0x282   : > { %v1170_v10 = vmax.f32 %v1092_v8, 0.0  ;;  %v1095_v11 = vadd.f32 %v1585_v9, %v2200_v33 }
 0x284   : > { %v1171_v12 = vmax.f32 %v1095_v11, 0.0  ;;  %v1586_v13 = vpop.f32.mrb[36].mxu1  ;;  %v1209_v14 = vmul.f32 %v2206_v37, %v1170_v10 }
 0x285   : > { %v1587_v15 = vpop.f32.mrb[37].mxu1 }
 0x286   : > { %v1588_v16 = vadd.f32 %v1587_v15, %v1586_v13  ;;  %v1589_v17 = vpop.f32.mrb[38].mxu1  ;;  %1257 = vadd.xlane.f32.xlu0 %v1209_v14  ;;  %v1210_v18 = vmul.f32 %v2206_v37, %v1171_v12 }
 0x287   : > { %v1590_v19 = vpop.f32.mrb[39].mxu1 }
 0x288   : > { %v1100_v20 = vadd.f32 %v1588_v16, %v2200_v33  ;;  %v1591_v21 = vadd.f32 %v1590_v19, %v1589_v17  ;;  %1259 = vadd.xlane.f32.xlu1 %v1210_v18 }
 0x28a   : > { %v1172_v22 = vmax.f32 %v1100_v20, 0.0  ;;  %v1103_v23 = vadd.f32 %v1591_v21, %v2200_v33 }
 0x28c   : > { %v1173_v24 = vmax.f32 %v1103_v23, 0.0  ;;  %v1592_v25 = vpop.f32.mrb[40].mxu1  ;;  %v1211_v26 = vmul.f32 %v2206_v37, %v1172_v22 }
 0x28d   : > { %v1593_v27 = vpop.f32.mrb[41].mxu1 }
 0x28e   : > { %v1594_v28 = vadd.f32 %v1593_v27, %v1592_v25  ;;  %v1595_v29 = vpop.f32.mrb[42].mxu1  ;;  %1261 = vadd.xlane.f32.xlu0 %v1211_v26  ;;  %v1212_v30 = vmul.f32 %v2206_v37, %v1173_v24 }
 0x28f   : > { %v1596_v31 = vpop.f32.mrb[43].mxu1 }
 0x290   : > { %v1108_v32 = vadd.f32 %v1594_v28, %v2200_v33  ;;  %v1597_v55 = vadd.f32 %v1596_v31, %v1595_v29  ;;  %1263 = vadd.xlane.f32.xlu1 %v1212_v30 }
 0x292   : > { %v1174_v34 = vmax.f32 %v1108_v32, 0.0  ;;  %v1111_v35 = vadd.f32 %v1597_v55, %v2200_v33 }
 0x294   : > { %v1175_v36 = vmax.f32 %v1111_v35, 0.0  ;;  %v1598_v56 = vpop.f32.mrb[44].mxu1  ;;  %v1213_v38 = vmul.f32 %v2206_v37, %v1174_v34 }
 0x295   : > { %v1599_v39 = vpop.f32.mrb[45].mxu1 }
 0x296   : > { %v1600_v40 = vadd.f32 %v1599_v39, %v1598_v56  ;;  %v1601_v41 = vpop.f32.mrb[46].mxu1  ;;  %1265 = vadd.xlane.f32.xlu0 %v1213_v38  ;;  %v1214_v42 = vmul.f32 %v2206_v37, %v1175_v36  ;;  %v2273_v56 = vld [vmem:[#allocation2] ss:$0 sm:$0xff] }
 0x297   : > { %v1602_v43 = vpop.f32.mrb[47].mxu1 }
 0x298   : > { %v1116_v44 = vadd.f32 %v1600_v40, %v2200_v33  ;;  %v1603_v45 = vadd.f32 %v1602_v43, %v1601_v41  ;;  %1267 = vadd.xlane.f32.xlu1 %v1214_v42 }
 0x29a   : > { %v1176_v46 = vmax.f32 %v1116_v44, 0.0  ;;  %v1119_v47 = vadd.f32 %v1603_v45, %v2200_v33 }
 0x29c   : > { %v1177_v48 = vmax.f32 %v1119_v47, 0.0  ;;  %v1604_v49 = vpop.f32.mrb[48].mxu1  ;;  %v1215_v50 = vmul.f32 %v2206_v37, %v1176_v46 }
 0x29d   : > { %v1605_v51 = vpop.f32.mrb[49].mxu1 }
 0x29e   : > { %v1606_v52 = vadd.f32 %v1605_v51, %v1604_v49  ;;  %v1607_v53 = vpop.f32.mrb[50].mxu1  ;;  %1269 = vadd.xlane.f32.xlu0 %v1215_v50  ;;  %v1216_v54 = vmul.f32 %v2206_v37, %v1177_v48 }
 0x29f   : > { %v1608_v57 = vpop.f32.mrb[51].mxu1 }
 0x2a0   : > { %v1124_v58 = vadd.f32 %v1606_v52, %v2200_v33  ;;  %v1609_v59 = vadd.f32 %v1608_v57, %v1607_v53  ;;  %1271 = vadd.xlane.f32.xlu1 %v1216_v54 }
 0x2a2   : > { %v1178_v60 = vmax.f32 %v1124_v58, 0.0  ;;  %v1127_v61 = vadd.f32 %v1609_v59, %v2200_v33 }
 0x2a4   : > { %v1179_v62 = vmax.f32 %v1127_v61, 0.0  ;;  %v1610_v63 = vpop.f32.mrb[52].mxu1  ;;  %v1217_v0 = vmul.f32 %v2206_v37, %v1178_v60 }
 0x2a5   : > { %v1611_v1 = vpop.f32.mrb[53].mxu1 }
 0x2a6   : > { %v1612_v2 = vadd.f32 %v1611_v1, %v1610_v63  ;;  %v1613_v3 = vpop.f32.mrb[54].mxu1  ;;  %1273 = vadd.xlane.f32.xlu0 %v1217_v0  ;;  %v1218_v4 = vmul.f32 %v2206_v37, %v1179_v62 }
 0x2a7   : > { %v1614_v5 = vpop.f32.mrb[55].mxu1 }
 0x2a8   : > { %v1132_v6 = vadd.f32 %v1612_v2, %v2200_v33  ;;  %v1615_v7 = vadd.f32 %v1614_v5, %v1613_v3  ;;  %1275 = vadd.xlane.f32.xlu1 %v1218_v4 }
 0x2aa   : > { %v1180_v8 = vmax.f32 %v1132_v6, 0.0  ;;  %v1135_v9 = vadd.f32 %v1615_v7, %v2200_v33 }
 0x2ac   : > { %v1181_v10 = vmax.f32 %v1135_v9, 0.0  ;;  %v1616_v11 = vpop.f32.mrb[56].mxu1  ;;  %v1219_v12 = vmul.f32 %v2206_v37, %v1180_v8 }
 0x2ad   : > { %v1617_v13 = vpop.f32.mrb[57].mxu1 }
 0x2ae   : > { %v1618_v14 = vadd.f32 %v1617_v13, %v1616_v11  ;;  %v1619_v15 = vpop.f32.mrb[58].mxu1  ;;  %1277 = vadd.xlane.f32.xlu0 %v1219_v12  ;;  %v1220_v16 = vmul.f32 %v2206_v37, %v1181_v10 }
 0x2af   : > { %v1620_v17 = vpop.f32.mrb[59].mxu1 }
 0x2b0   : > { %v1140_v18 = vadd.f32 %v1618_v14, %v2200_v33  ;;  %v1621_v19 = vadd.f32 %v1620_v17, %v1619_v15  ;;  %1279 = vadd.xlane.f32.xlu1 %v1220_v16 }
 0x2b2   : > { %v1182_v20 = vmax.f32 %v1140_v18, 0.0  ;;  %v1143_v21 = vadd.f32 %v1621_v19, %v2200_v33 }
 0x2b4   : > { %v1183_v22 = vmax.f32 %v1143_v21, 0.0  ;;  %v1622_v23 = vpop.f32.mrb[60].mxu1  ;;  %v1221_v24 = vmul.f32 %v2206_v37, %v1182_v20 }
 0x2b5   : > { %v1623_v25 = vpop.f32.mrb[61].mxu1 }
 0x2b6   : > { %v1624_v26 = vadd.f32 %v1623_v25, %v1622_v23  ;;  %v1625_v27 = vpop.f32.mrb[62].mxu1  ;;  %1281 = vadd.xlane.f32.xlu0 %v1221_v24  ;;  %v1222_v28 = vmul.f32 %v2206_v37, %v1183_v22 }
 0x2b7   : > { %v1626_v29 = vpop.f32.mrb[63].mxu1 }
 0x2b8   : > { %v1148_v30 = vadd.f32 %v1624_v26, %v2200_v33  ;;  %v1627_v31 = vadd.f32 %v1626_v29, %v1625_v27  ;;  %1283 = vadd.xlane.f32.xlu1 %v1222_v28 }
 0x2ba   : > { %v1184_v32 = vmax.f32 %v1148_v30, 0.0  ;;  %v1151_v55 = vadd.f32 %v1627_v31, %v2200_v33 }
 0x2bc   : > { %v1185_v34 = vmax.f32 %v1151_v55, 0.0  ;;  %v1223_v35 = vmul.f32 %v2206_v37, %v1184_v32 }
 0x2be   : > { %1285 = vadd.xlane.f32.xlu0 %v1223_v35  ;;  %v1224_v36 = vmul.f32 %v2206_v37, %v1185_v34 }
 0x2c0   : > { %1287 = vadd.xlane.f32.xlu1 %v1224_v36 }
 0x2d3   : > { %v1226_v33 = vpop.xlane.xlu0 %1225 }
 0x2d4   : > { %v1296_v37 = vadd.f32 %v2273_v56, %v1226_v33 }
 0x2d6   : > { %1329 = vst.msk [vmem:[%s2278_s12] sm:$0xff] %vm1328_vm0, %v1296_v37 }
 0x2d7   : > { %v1228_v38 = vpop.xlane.xlu0 %1227 }
 0x2d8   : > { %v1297_v39 = vadd.f32 %v2273_v56, %v1228_v38 }
 0x2da   : > { %1330 = vst.msk [vmem:[%s2278_s12 + $0x8] sm:$0xff] %vm1328_vm0, %v1297_v39 }
 0x2db   : > { %v1230_v40 = vpop.xlane.xlu1 %1229 }
 0x2dc   : > { %v1298_v41 = vadd.f32 %v2273_v56, %v1230_v40 }
 0x2de   : > { %1331 = vst.msk [vmem:[%s2278_s12 + $0x10] sm:$0xff] %vm1328_vm0, %v1298_v41 }
 0x2df   : > { %v1232_v42 = vpop.xlane.xlu1 %1231 }
 0x2e0   : > { %v1299_v43 = vadd.f32 %v2273_v56, %v1232_v42 }
 0x2e2   : > { %1332 = vst.msk [vmem:[%s2278_s12 + $0x18] sm:$0xff] %vm1328_vm0, %v1299_v43 }
 0x2e3   : > { %v1234_v44 = vpop.xlane.xlu0 %1233 }
 0x2e4   : > { %v1300_v45 = vadd.f32 %v2273_v56, %v1234_v44 }
 0x2e5   : > { %v1236_v46 = vpop.xlane.xlu1 %1235 }
 0x2e6   : > { %1333 = vst.msk [vmem:[%s2278_s12 + $0x20] sm:$0xff] %vm1328_vm0, %v1300_v45  ;;  %v1301_v47 = vadd.f32 %v2273_v56, %v1236_v46 }
 0x2e8   : > { %1334 = vst.msk [vmem:[%s2278_s12 + $0x28] sm:$0xff] %vm1328_vm0, %v1301_v47 }
 0x2eb   : > { %v1238_v48 = vpop.xlane.xlu0 %1237 }
 0x2ec   : > { %v1302_v49 = vadd.f32 %v2273_v56, %v1238_v48 }
 0x2ed   : > { %v1240_v50 = vpop.xlane.xlu1 %1239 }
 0x2ee   : > { %1335 = vst.msk [vmem:[%s2278_s12 + $0x30] sm:$0xff] %vm1328_vm0, %v1302_v49  ;;  %v1303_v51 = vadd.f32 %v2273_v56, %v1240_v50 }
 0x2f0   : > { %1336 = vst.msk [vmem:[%s2278_s12 + $0x38] sm:$0xff] %vm1328_vm0, %v1303_v51 }
 0x2f3   : > { %v1242_v52 = vpop.xlane.xlu0 %1241 }
 0x2f4   : > { %v1304_v53 = vadd.f32 %v2273_v56, %v1242_v52 }
 0x2f5   : > { %v1244_v54 = vpop.xlane.xlu1 %1243 }
 0x2f6   : > { %1337 = vst.msk [vmem:[%s2278_s12 + $0x40] sm:$0xff] %vm1328_vm0, %v1304_v53  ;;  %v1305_v57 = vadd.f32 %v2273_v56, %v1244_v54 }
 0x2f8   : > { %1338 = vst.msk [vmem:[%s2278_s12 + $0x48] sm:$0xff] %vm1328_vm0, %v1305_v57 }
 0x2fb   : > { %v1246_v58 = vpop.xlane.xlu0 %1245 }
 0x2fc   : > { %v1306_v59 = vadd.f32 %v2273_v56, %v1246_v58 }
 0x2fd   : > { %v1248_v60 = vpop.xlane.xlu1 %1247 }
 0x2fe   : > { %1339 = vst.msk [vmem:[%s2278_s12 + $0x50] sm:$0xff] %vm1328_vm0, %v1306_v59  ;;  %v1307_v61 = vadd.f32 %v2273_v56, %v1248_v60 }
 0x300   : > { %1340 = vst.msk [vmem:[%s2278_s12 + $0x58] sm:$0xff] %vm1328_vm0, %v1307_v61 }
 0x303   : > { %v1250_v62 = vpop.xlane.xlu0 %1249 }
 0x304   : > { %v1308_v63 = vadd.f32 %v2273_v56, %v1250_v62 }
 0x305   : > { %v1252_v0 = vpop.xlane.xlu1 %1251 }
 0x306   : > { %1341 = vst.msk [vmem:[%s2278_s12 + $0x60] sm:$0xff] %vm1328_vm0, %v1308_v63  ;;  %v1309_v1 = vadd.f32 %v2273_v56, %v1252_v0 }
 0x308   : > { %1342 = vst.msk [vmem:[%s2278_s12 + $0x68] sm:$0xff] %vm1328_vm0, %v1309_v1 }
 0x30b   : > { %v1254_v2 = vpop.xlane.xlu0 %1253 }
 0x30c   : > { %v1310_v3 = vadd.f32 %v2273_v56, %v1254_v2 }
 0x30d   : > { %v1256_v4 = vpop.xlane.xlu1 %1255 }
 0x30e   : > { %1343 = vst.msk [vmem:[%s2278_s12 + $0x70] sm:$0xff] %vm1328_vm0, %v1310_v3  ;;  %v1311_v5 = vadd.f32 %v2273_v56, %v1256_v4 }
 0x310   : > { %1344 = vst.msk [vmem:[%s2278_s12 + $0x78] sm:$0xff] %vm1328_vm0, %v1311_v5 }
 0x313   : > { %v1258_v6 = vpop.xlane.xlu0 %1257 }
 0x314   : > { %v1312_v7 = vadd.f32 %v2273_v56, %v1258_v6 }
 0x315   : > { %v1260_v8 = vpop.xlane.xlu1 %1259 }
 0x316   : > { %1345 = vst.msk [vmem:[%s2278_s12 + $0x80] sm:$0xff] %vm1328_vm0, %v1312_v7  ;;  %v1313_v9 = vadd.f32 %v2273_v56, %v1260_v8 }
 0x318   : > { %1346 = vst.msk [vmem:[%s2278_s12 + $0x88] sm:$0xff] %vm1328_vm0, %v1313_v9 }
 0x31b   : > { %v1262_v10 = vpop.xlane.xlu0 %1261 }
 0x31c   : > { %v1314_v11 = vadd.f32 %v2273_v56, %v1262_v10 }
 0x31d   : > { %v1264_v12 = vpop.xlane.xlu1 %1263 }
 0x31e   : > { %1347 = vst.msk [vmem:[%s2278_s12 + $0x90] sm:$0xff] %vm1328_vm0, %v1314_v11  ;;  %v1315_v13 = vadd.f32 %v2273_v56, %v1264_v12 }
 0x320   : > { %1348 = vst.msk [vmem:[%s2278_s12 + $0x98] sm:$0xff] %vm1328_vm0, %v1315_v13 }
 0x323   : > { %v1266_v14 = vpop.xlane.xlu0 %1265 }
 0x324   : > { %v1316_v15 = vadd.f32 %v2273_v56, %v1266_v14 }
 0x325   : > { %v1268_v16 = vpop.xlane.xlu1 %1267 }
 0x326   : > { %1349 = vst.msk [vmem:[%s2278_s12 + $0xa0] sm:$0xff] %vm1328_vm0, %v1316_v15  ;;  %v1317_v17 = vadd.f32 %v2273_v56, %v1268_v16 }
 0x328   : > { %1350 = vst.msk [vmem:[%s2278_s12 + $0xa8] sm:$0xff] %vm1328_vm0, %v1317_v17 }
 0x32b   : > { %v1270_v18 = vpop.xlane.xlu0 %1269 }
 0x32c   : > { %v1318_v19 = vadd.f32 %v2273_v56, %v1270_v18 }
 0x32d   : > { %v1272_v20 = vpop.xlane.xlu1 %1271 }
 0x32e   : > { %1351 = vst.msk [vmem:[%s2278_s12 + $0xb0] sm:$0xff] %vm1328_vm0, %v1318_v19  ;;  %v1319_v21 = vadd.f32 %v2273_v56, %v1272_v20 }
 0x330   : > { %1352 = vst.msk [vmem:[%s2278_s12 + $0xb8] sm:$0xff] %vm1328_vm0, %v1319_v21 }
 0x333   : > { %v1274_v22 = vpop.xlane.xlu0 %1273 }
 0x334   : > { %v1320_v23 = vadd.f32 %v2273_v56, %v1274_v22 }
 0x335   : > { %v1276_v24 = vpop.xlane.xlu1 %1275 }
 0x336   : > { %1353 = vst.msk [vmem:[%s2278_s12 + $0xc0] sm:$0xff] %vm1328_vm0, %v1320_v23  ;;  %v1321_v25 = vadd.f32 %v2273_v56, %v1276_v24 }
 0x338   : > { %1354 = vst.msk [vmem:[%s2278_s12 + $0xc8] sm:$0xff] %vm1328_vm0, %v1321_v25 }
 0x33b   : > { %v1278_v26 = vpop.xlane.xlu0 %1277 }
 0x33c   : > { %v1322_v27 = vadd.f32 %v2273_v56, %v1278_v26 }
 0x33d   : > { %v1280_v28 = vpop.xlane.xlu1 %1279 }
 0x33e   : > { %1355 = vst.msk [vmem:[%s2278_s12 + $0xd0] sm:$0xff] %vm1328_vm0, %v1322_v27  ;;  %v1323_v29 = vadd.f32 %v2273_v56, %v1280_v28 }
 0x340   : > { %1356 = vst.msk [vmem:[%s2278_s12 + $0xd8] sm:$0xff] %vm1328_vm0, %v1323_v29 }
 0x343   : > { %v1282_v30 = vpop.xlane.xlu0 %1281 }
 0x344   : > { %v1324_v31 = vadd.f32 %v2273_v56, %v1282_v30 }
 0x345   : > { %v1284_v32 = vpop.xlane.xlu1 %1283 }
 0x346   : > { %1357 = vst.msk [vmem:[%s2278_s12 + $0xe0] sm:$0xff] %vm1328_vm0, %v1324_v31  ;;  %v1325_v55 = vadd.f32 %v2273_v56, %v1284_v32 }
 0x348   : > { %1358 = vst.msk [vmem:[%s2278_s12 + $0xe8] sm:$0xff] %vm1328_vm0, %v1325_v55 }
 0x34b   : > { %v1286_v34 = vpop.xlane.xlu0 %1285 }
 0x34c   : > { %v1326_v35 = vadd.f32 %v2273_v56, %v1286_v34 }
 0x34d   : > { %v1288_v36 = vpop.xlane.xlu1 %1287 }
 0x34e   : > { %1359 = vst.msk [vmem:[%s2278_s12 + $0xf0] sm:$0xff] %vm1328_vm0, %v1326_v35  ;;  %v1327_v33 = vadd.f32 %v2273_v56, %v1288_v36 }
 0x350   : > { %1360 = vst.msk [vmem:[%s2278_s12 + $0xf8] sm:$0xff] %vm1328_vm0, %v1327_v33 }
 0x351 PF: > { %p20_p6 = scmp.ge.s32.totalorder %s2025_s24, 4   ;;  %s2409_s26 = smov %s1865_s27 }
 0x352   : > { %s2410_s27 = smov %s1869_s28  ;;  %s2411_s28 = smov %s2034_s10 }
 0x353   : > { %s2412_s29 = smov %s2025_s24  ;;  %22 = sbr.rel (!%p20_p6) target bundleno = 7 (0x7), region = 96 }
 0x35a   :  { %1383 = vsyncpa [#allocation4], 1 }
 0x35b   :  { %1385 = vsyncpa [#allocation4 + $0x1], 1 }
 0x35c   :  { %1386 = vsyncpa [#allocation6], 1 }

</bundles_post_ra>
